<compile_context>
chip_gen: v6e
topology: v6e:2x2x1
jax: 0.10.0
libtpu: 0.0.40
codegen_flags: <defaults>
</compile_context>

<pallas_src>
import math

import jax
import jax.numpy as jnp
from jax import lax
from jax.experimental import pallas as pl
from jax.experimental.pallas import tpu as pltpu


def _round_up(x: int, m: int) -> int:
    return (x + m - 1) // m * m


# ---------------------------------------------------------------------------
# Tiled kernels (large shapes).
# ---------------------------------------------------------------------------

def _accumulate_step(x_ref, w_ref, acc_ref):
    """One (i, j, k) step of y = x @ W.T - x * diag(W) into a resident f32 acc.

    x_ref  : (tm, tk) tile of x      (row tile i, contraction tile k)
    w_ref  : (tn, tk) tile of W      (output-col tile j, contraction tile k)
    acc_ref: (tm, tn) f32 accumulator (resident across the k axis)
    """
    j = pl.program_id(1)
    k = pl.program_id(2)

    @pl.when(k == 0)
    def _():
        acc_ref[...] = jnp.zeros_like(acc_ref)

    # Unconditional MXU matmul, contracting W in its stored layout (x @ W.T),
    # so no per-tile transpose/relayout and no duplicated code path.
    acc_ref[...] += lax.dot_general(
        x_ref[...], w_ref[...], (((1,), (1,)), ((), ())),
        preferred_element_type=jnp.float32)

    # Diagonal correction:  y = x @ W.T - x * diag(W).
    # Only block-diagonal weight tiles (j == k, tn == tk) intersect the
    # diagonal; the iota/select/reduce is VPU/XLU work that overlaps the MXU.
    @pl.when(j == k)
    def _():
        w = w_ref[...].astype(jnp.float32)
        tn, tk = w.shape
        r = lax.broadcasted_iota(jnp.int32, (tn, tk), 0)
        c = lax.broadcasted_iota(jnp.int32, (tn, tk), 1)
        diag = jnp.sum(jnp.where(r == c, w, 0.0), axis=0, keepdims=True)  # (1, tk)
        acc_ref[...] -= x_ref[...].astype(jnp.float32) * diag


def _kernel_f32_out(x_ref, w_ref, o_ref):
    # f32 output: accumulate directly into the resident output block (its
    # index_map ignores k) -- no scratch and no final VMEM->VMEM copy.
    _accumulate_step(x_ref, w_ref, o_ref)


def _kernel_cast_out(x_ref, w_ref, o_ref, acc_ref):
    # Non-f32 output: f32 VMEM accumulator + cast epilogue on the last k step.
    _accumulate_step(x_ref, w_ref, acc_ref)

    @pl.when(pl.program_id(2) == pl.num_programs(2) - 1)
    def _():
        o_ref[...] = acc_ref[...].astype(o_ref.dtype)


# ---------------------------------------------------------------------------
# Small-shape fast path: whole problem fits in VMEM, single grid step,
# full-array blocks (no (8,128) padding needed when block == full dims).
# ---------------------------------------------------------------------------

def _small_kernel(x_ref, w_ref, o_ref):
    w = w_ref[...]
    d = w.shape[0]
    r = lax.broadcasted_iota(jnp.int32, (d, d), 0)
    c = lax.broadcasted_iota(jnp.int32, (d, d), 1)
    w_masked = jnp.where(r == c, jnp.zeros_like(w), w)
    o_ref[...] = lax.dot_general(
        x_ref[...], w_masked, (((1,), (1,)), ((), ())),
        preferred_element_type=jnp.float32).astype(o_ref.dtype)


# ---------------------------------------------------------------------------
# Wrapper.
# ---------------------------------------------------------------------------

def custom_linear(x: jax.Array, weight: jax.Array, *, tm: int | None = None,
                  tn: int | None = None,
                  compute_dtype: jnp.dtype | None = None) -> jax.Array:
    """x: (B, D), weight: (D, D) -> (B, D) = x @ (weight * (1 - eye(D))).T.

    compute_dtype: optional MXU operand dtype (e.g. jnp.bfloat16) -- halves the
    weight bandwidth; accumulation stays f32 and the output keeps x's dtype.
    """
    B, D = x.shape
    assert weight.shape == (D, D)
    out_dtype = x.dtype

    if compute_dtype is not None:
        x = x.astype(compute_dtype)
        weight = weight.astype(compute_dtype)
    in_itemsize = jnp.dtype(x.dtype).itemsize
    out_itemsize = jnp.dtype(out_dtype).itemsize

    # Small-shape fast path (covers the module's nominal B=8, D=32 case).
    if tm is None and tn is None and D <= 256 and B <= 1024:
        return pl.pallas_call(
            _small_kernel,
            out_shape=jax.ShapeDtypeStruct((B, D), out_dtype),
        )(x, weight)

    # ---- Tiled path ----
    Dp128 = _round_up(D, 128)
    auto = tm is None and tn is None
    if tn is None:
        tn = min(1024, Dp128)
    if tm is None:
        tm = min(512, _round_up(B, 8))
    assert tn % 128 == 0, "tn must be a multiple of 128"
    assert tm % 8 == 0, "tm must be a multiple of 8"
    tk = tn  # square weight tiles -> diagonal tile iff j == k

    # Megacore (v7x has 2 TensorCores): ensure >= 2 blocks on the parallel
    # (i, j) sub-grid when auto-tiling so both cores get work.
    if auto:
        i_blocks = _round_up(B, tm) // tm
        j_blocks = _round_up(Dp128, tn) // tn
        if i_blocks * j_blocks < 2:
            if Dp128 >= 256:
                tn = max(128, (Dp128 // 2) // 128 * 128)
                tk = tn
            elif _round_up(B, 8) >= 16:
                tm = max(8, (_round_up(B, 8) // 2) // 8 * 8)

    Bp = _round_up(B, tm)
    Dp = _round_up(D, tn)
    x_p = x if (Bp == B and Dp == D) else jnp.pad(x, ((0, Bp - B), (0, Dp - D)))
    w_p = weight if Dp == D else jnp.pad(weight, ((0, Dp - D), (0, Dp - D)))

    grid = (Bp // tm, Dp // tn, Dp // tk)

    needs_scratch = jnp.dtype(out_dtype) != jnp.dtype(jnp.float32)
    if needs_scratch:
        kernel = _kernel_cast_out
        scratch_shapes = [pltpu.VMEM((tm, tn), jnp.float32)]
    else:
        kernel = _kernel_f32_out
        scratch_shapes = []

    # Deeper pipelining on the weight stream (dominant HBM traffic); fall back
    # to default double-buffering if pipeline_mode is unavailable.
    w_map = lambda i, j, k: (j, k)
    try:
        w_spec = pl.BlockSpec((tn, tk), w_map, pipeline_mode=pl.Buffered(3))
        n_w_bufs = 3
    except (TypeError, AttributeError):
        w_spec = pl.BlockSpec((tn, tk), w_map)
        n_w_bufs = 2

    # Explicit VMEM budget for the chosen tiles (overrides v5e's 16 MiB scoped
    # default; stays well under v7x's 64 MiB physical VMEM).
    vmem_est = (2 * tm * tk * in_itemsize
                + n_w_bufs * tn * tk * in_itemsize
                + 2 * tm * tn * out_itemsize
                + (tm * tn * 4 if needs_scratch else 0))
    vmem_limit = min(max(2 * vmem_est + (4 << 20), 16 << 20), 100 << 20)

    # Padded shapes; W is re-read once per i-block.
    cost = pl.CostEstimate(
        flops=2 * Bp * Dp * Dp,
        transcendentals=0,
        bytes_accessed=(Bp * Dp * in_itemsize
                        + (Bp // tm) * Dp * Dp * in_itemsize
                        + Bp * Dp * out_itemsize),
    )

    y_p = pl.pallas_call(
        kernel,
        out_shape=jax.ShapeDtypeStruct((Bp, Dp), out_dtype),
        grid=grid,
        in_specs=[
            pl.BlockSpec((tm, tk), lambda i, j, k: (i, k)),   # x tile
            w_spec,                                           # W tile
        ],
        out_specs=pl.BlockSpec((tm, tn), lambda i, j, k: (i, j)),
        scratch_shapes=scratch_shapes,
        compiler_params=pltpu.CompilerParams(
            dimension_semantics=("parallel", "parallel", "arbitrary"),
            vmem_limit_bytes=vmem_limit,
        ),
        cost_estimate=cost,
    )(x_p, w_p)

    return y_p[:B, :D]


# ---------------------------------------------------------------------------
# Reference / test.
# ---------------------------------------------------------------------------

def xavier_uniform(key, shape, dtype=jnp.float32):
    fan_in, fan_out = shape[1], shape[0]
    bound = math.sqrt(6.0 / (fan_in + fan_out))
    return jax.random.uniform(key, shape, dtype=dtype, minval=-bound, maxval=bound)


def reference(x, weight):
    d = weight.shape[0]
    masked = weight * (jnp.ones((d, d), weight.dtype) - jnp.eye(d, dtype=weight.dtype))
    return x @ masked.T


if __name__ == "__main__":
    key = jax.random.PRNGKey(0)
    k_w, k_x, k_w2, k_x2, k_w3, k_x3 = jax.random.split(key, 6)

    # 1) Module's nominal shape (input_dim=32, batch=8) -> small fast path.
    D, B = 32, 8
    weight = xavier_uniform(k_w, (D, D))
    x = jax.random.normal(k_x, (B, D), jnp.float32)
    y = custom_linear(x, weight)
    jax.block_until_ready(y)
    y_ref = reference(x, weight)
    assert jnp.allclose(y, y_ref, atol=1e-5, rtol=1e-5), "mismatch (small path)"

    # 2) Tiled path: multi-block grid (2, 2, 2) exercising the unconditional
    #    matmul, the diagonal correction and the resident f32 output block.
    D2, B2 = 256, 64
    weight2 = xavier_uniform(k_w2, (D2, D2))
    x2 = jax.random.normal(k_x2, (B2, D2), jnp.float32)
    y2 = custom_linear(x2, weight2, tm=32, tn=128)
    jax.block_until_ready(y2)
    y2_ref = reference(x2, weight2)
    assert jnp.allclose(y2, y2_ref, atol=1e-4, rtol=1e-4), "mismatch (tiled f32)"

    # 3) bf16 MXU operands with f32 accumulator + cast epilogue (scratch path).
    D3, B3 = 256, 64
    weight3 = xavier_uniform(k_w3, (D3, D3)).astype(jnp.bfloat16)
    x3 = jax.random.normal(k_x3, (B3, D3), jnp.float32).astype(jnp.bfloat16)
    y3 = custom_linear(x3, weight3, tm=64, tn=128)
    jax.block_until_ready(y3)
    y3_ref = reference(x3.astype(jnp.float32), weight3.astype(jnp.float32))
    assert jnp.allclose(y3.astype(jnp.float32), y3_ref, atol=5e-2, rtol=5e-2), \
        "mismatch (tiled bf16)"

    print("KERNEL_OK")
</pallas_src>

<mosaic_0001>
module attributes {stable_mosaic.version = 11 : i64} {
  func.func @_small_kernel(%arg0: memref<8x32xf32, #tpu.memory_space<vmem>>, %arg1: memref<32x32xf32, #tpu.memory_space<vmem>>, %arg2: memref<8x32xf32, #tpu.memory_space<vmem>>) attributes {dimension_semantics = [], scalar_prefetch = 0 : i64, scratch_operands = 0 : i64, tpu.core_type = #tpu.core_type<tc>} {
    %c0 = arith.constant 0 : index
    %c0_0 = arith.constant 0 : index
    %0 = vector.load %arg1[%c0, %c0_0] : memref<32x32xf32, #tpu.memory_space<vmem>>, vector<32x32xf32>
    %1 = tpu.iota {dimensions = array<i32: 0>} : vector<32x32xi32>
    %2 = tpu.iota {dimensions = array<i32: 1>} : vector<32x32xi32>
    %3 = arith.cmpi eq, %1, %2 : vector<32x32xi32>
    %cst = arith.constant 0.000000e+00 : f32
    %4 = vector.broadcast %cst : f32 to vector<32x32xf32>
    %5 = arith.select %3, %4, %0 : vector<32x32xi1>, vector<32x32xf32>
    %c0_1 = arith.constant 0 : index
    %c0_2 = arith.constant 0 : index
    %6 = vector.load %arg0[%c0_1, %c0_2] : memref<8x32xf32, #tpu.memory_space<vmem>>, vector<8x32xf32>
    %cst_3 = arith.constant dense<0.000000e+00> : vector<8x32xf32>
    %7 = tpu.matmul %6, %5, %cst_3 {dimension_numbers = #tpu.dot_dimension_numbers<[1], [1], [0], [0], [0, 0, 1, 0], [], []>} : vector<8x32xf32>, vector<32x32xf32>, vector<8x32xf32> -> vector<8x32xf32>
    %c0_4 = arith.constant 0 : index
    %c0_5 = arith.constant 0 : index
    %8 = vector.load %arg2[%c0_4, %c0_5] : memref<8x32xf32, #tpu.memory_space<vmem>>, vector<8x32xf32>
    tpu.vector_store %arg2[%c0_4, %c0_5], %7 {strides = array<i32>} : memref<8x32xf32, #tpu.memory_space<vmem>>, vector<8x32xf32>,
    return
  }
}

</mosaic_0001>

<bundles_post_ra>
// kernel: tpu_custom_call.1
= control target key start
LH: loop header
LB: loop body
LE: loop exit
PB: predicated region body
PF: predicated region fallthrough
CT: control target
= control target key end

     0   :  { %7 = vsyncpa [#allocation3], 0  ;;  %s292_s0 = inlined_call_operand.hbm [shape: f32[8,32], index: 0, kind: input, shape index: {}]   ;;  %s293_s1 = inlined_call_operand.hbm [shape: f32[32,32], index: 1, kind: input, shape index: {}]   ;;  %s294_s2 = inlined_call_operand.hbm [shape: f32[8,32], index: 2, kind: output, shape index: {}]  }
   0x1   :  { %8 = vsyncpa [#allocation6], 0 }
   0x2   :  { %9 = vsyncpa [#allocation4], 0  ;;  %s255_s9 = smov [#allocation2]   ;;  %s256_s11 = smov [#allocation5]  }
   0x3   :  { %s16_s10 = sshll.u32 %s255_s9, 4  ;;  %s25_s12 = sshll.u32 %s256_s11, 4  ;;  %s17_s10 = int_to_ptr.vmem [resolvable:$true] %s16_s10  ;;  %s26_s12 = int_to_ptr.vmem [resolvable:$true] %s25_s12 }
   0x4   :  { %s197_s13 = scalar_lea.vmem %s17_s10, 128  ;;  %p202_p1 = scmp.lt.s32.totalorder %s17_s10, %s17_s10 }
   0x5   :  { %p198_p0 = scmp.ne.s32.totalorder %s17_s10, %s197_s13  ;;  %p203_p2 = scmp.lt.s32.totalorder %s197_s13, %s197_s13 }
   0x7   :  { %p204_p3 = por %p203_p2, %p202_p1 }
   0x9   :  { %p205_p4 = pnand %p204_p3, %p198_p0 }
   0xb   :  { %208 = shalt.err (!%p205_p4)
}
   0xc   :  { %19 = dma.hbm_to_vmem [thread:$0]  %s292_s0, 128, %s17_s10, [#allocation3]  }
   0xd   :  { %s217_s16 = scalar_lea.vmem %s26_s12, 512  ;;  %p222_p6 = scmp.lt.s32.totalorder %s26_s12, %s26_s12 }
   0xe   :  { %p218_p5 = scmp.ne.s32.totalorder %s26_s12, %s217_s16  ;;  %p223_p7 = scmp.lt.s32.totalorder %s217_s16, %s217_s16 }
  0x10   :  { %p224_p8 = por %p223_p7, %p222_p6 }
  0x12   :  { %p225_p9 = pnand %p224_p8, %p218_p5 }
  0x14   :  { %228 = shalt.err (!%p225_p9)
}
  0x15   :  { %s257_s17 = smov 128   ;;  %s258_s18 = smov 8  }
  0x16   :  { %31 = dma.hbm_to_vmem [thread:$0]  %s293_s1, 512, %s26_s12, [#allocation6], %s257_s17, %s257_s17, %s258_s18  }
  0x17   :  { %249 = dma.done.wait [#allocation3], 128  }
  0x18   :  { %250 = vsyncadd [#allocation3], 4294967168 }
  0x19   :  { %251 = dma.done.wait [#allocation6], 512  }
  0x1a   :  { %252 = vsyncadd [#allocation6], 4294966784  ;;  %v42_v0 = vlaneseq  ;;  %v259_v1 = vmov 0.0   ;;  %vm260_vm0 = vmmov 0   ;;  %vm58_vm2 = vcmask 261120   ;;  %v41_v6 = vld [vmem:[#allocation5 + $0x18] sm:$0xff] }
  0x1b   :  { %171 = vmatprep.subr.mxu0 %v259_v1  ;;  %179 = vmatprep.mubr.msk.f32.mxu0 %vm260_vm0, %v259_v1  ;;  %v40_v7 = vld [vmem:[#allocation5 + $0x10] sm:$0xff]  ;;  %v39_v11 = vld [vmem:[#allocation5 + $0x8] sm:$0xff]  ;;  %v38_v13 = vld [vmem:[#allocation5] sm:$0xff]  ;;  %s261_s0 = smov [#allocation7]  }
  0x1c   :  { %v43_v2 = vshrl.u32 %v42_v0, 7  ;;  %v48_v3 = vand.u32 127, %v42_v0  ;;  %v57_v15 = vld [vmem:[#allocation2] sm:$0xff]  ;;  %s151_s1 = sshll.u32 %s261_s0, 4  ;;  %s152_s1 = int_to_ptr.vmem [resolvable:$true] %s151_s1 }
  0x1d   :  { %s229_s21 = scalar_lea.vmem %s152_s1, 128  ;;  %p234_p11 = scmp.lt.s32.totalorder %s152_s1, %s152_s1 }
  0x1e   :  { %v46_v4 = vadd.s32 24, %v43_v2  ;;  %v45_v5 = vadd.s32 16, %v43_v2  ;;  %v44_v8 = vadd.s32 8, %v43_v2  ;;  %vm49_vm5 = vcmp.eq.s32.totalorder %v43_v2, %v48_v3  ;;  %p230_p10 = scmp.ne.s32.totalorder %s152_s1, %s229_s21  ;;  %p235_p12 = scmp.lt.s32.totalorder %s229_s21, %s229_s21 }
  0x1f   :  { %v53_v14 = vsel %vm49_vm5, 0.0, %v38_v13 }
  0x20   :  { %vm52_vm1 = vcmp.eq.s32.totalorder %v46_v4, %v48_v3  ;;  %vm51_vm3 = vcmp.eq.s32.totalorder %v45_v5, %v48_v3  ;;  %vm50_vm4 = vcmp.eq.s32.totalorder %v44_v8, %v48_v3  ;;  %p236_p13 = por %p235_p12, %p234_p11 }
  0x21   :  { %v56_v9 = vsel %vm52_vm1, 0.0, %v41_v6  ;;  %v55_v10 = vsel %vm51_vm3, 0.0, %v40_v7  ;;  %v54_v12 = vsel %vm50_vm4, 0.0, %v39_v11 }
  0x22   :  { %172 = vmatpush3.xpose.msk.msra.mxu0 %vm58_vm2, %v56_v9  ;;  %p237_p0 = pnand %p236_p13, %p230_p10 }
  0x23   :  { %173 = vmatprep.subr.mxu0 %v259_v1 }
  0x26   :  { %174 = vmatpush3.xpose.msk.msra.mxu0 %vm58_vm2, %v55_v10 }
  0x27   :  { %175 = vmatprep.subr.mxu0 %v259_v1 }
  0x2a   :  { %176 = vmatpush3.xpose.msk.msra.mxu0 %vm58_vm2, %v54_v12 }
  0x2b   :  { %177 = vmatprep.subr.mxu0 %v259_v1 }
  0x2e   :  { %178 = vmatpush3.xpose.msk.msra.mxu0 %vm58_vm2, %v53_v14 }
  0x31   :  { %180 = vmatmul.mubr.msk.f32.vlgmr.msra.gmra.mxu0 %vm58_vm2, %v57_v15 }
  0xf1   :  { %v140_v16 = vpop.f32.mrf.mxu0 }
  0xf2   :  { %144 = vst.msk [vmem:[#allocation7] sm:$0xff] %vm58_vm2, %v140_v16 }
  0xf3   :  { %v181_v17 = vpop.f32.mrf.mxu0 }
  0xf4   :  { %240 = shalt.err (!%p237_p0)
}
  0xf5   :  { %154 = dma.vmem_to_hbm [thread:$0]  %s152_s1, 128, %s294_s2, [#allocation4]  }
  0xf6   :  { %253 = dma.done.wait [#allocation4], 128  }
  0xf7   :  { %254 = vsyncadd [#allocation4], 4294967168 }
  0xf8   :  { %158 = vsyncpa [#allocation3], 1 }
  0xf9   :  { %159 = vsyncpa [#allocation6], 1 }
  0xfa   :  { %160 = vsyncpa [#allocation4], 1 }

</bundles_post_ra>
